<compile_context>
chip_gen: v5e
topology: v5e:2x2
jax: 0.10.0
libtpu: 0.0.40
codegen_flags: <defaults>
</compile_context>

<pallas_src>
import numpy as np
import jax
import jax.numpy as jnp
from jax.experimental import pallas as pl
from jax.experimental.pallas import tpu as pltpu


# ---------------- parameter / weight construction (plain numpy glue) ----------------

def nearest_odd_integer(number, higher=True):
    integer = int(np.ceil(number))
    odd = integer if integer % 2 == 1 else integer + 1
    return odd if higher else odd - 2


def appropriate_kernel_size(std: float) -> int:
    return max(nearest_odd_integer(5 * std), 3)


def gaussian_kernel_1d(std: float, kernel_size: int) -> np.ndarray:
    # Matches the torch module: x = range(-k//2+1, k//2+1)
    x = np.arange(-(kernel_size // 2), kernel_size // 2 + 1, dtype=np.float32)
    std = np.float32(std)
    g = np.exp(-(x ** 2 / (2.0 * std ** 2)) / np.float32(np.sqrt(2.0 * np.pi) * std))
    g = g / g.sum()
    return g.astype(np.float32)


def banded_toeplitz(g: np.ndarray, pad: int, n: int) -> np.ndarray:
    """T[a, b] = g[a - b + pad] inside the band, else 0.  (n, n), symmetric for a
    symmetric gaussian kernel."""
    idx = np.arange(n)
    d = idx[:, None] - idx[None, :] + pad
    valid = (d >= 0) & (d < g.shape[0])
    return np.where(valid, g[np.clip(d, 0, g.shape[0] - 1)], 0.0).astype(np.float32)


# ---------------------------- Pallas kernels (hot paths) ----------------------------

def _fused_kron_kernel(x_ref, m_ref, o_ref):
    """Small-image path: whole blur as one lane-dense MXU matmul.

    x_ref: (bb, HW) input dtype; m_ref: (HW, HW) bf16 = kron(T_H, T_W); o_ref: (bb, HW).
    """
    x = x_ref[...].astype(jnp.bfloat16)
    out = jnp.dot(x, m_ref[...], preferred_element_type=jnp.float32)
    o_ref[...] = out.astype(o_ref.dtype)


def _make_two_pass_kernel(square: bool):
    """Two-pass path over a (bb, H, W) block of images.

    square=True  -> refs = (x_ref, t_ref, o_ref); Tv == Th (symmetric gaussian).
    square=False -> refs = (x_ref, th_ref, tv_ref, o_ref).
    """

    def kernel(*refs):
        if square:
            x_ref, th_ref, o_ref = refs
            th = th_ref[...]                      # (W, W) bf16, symmetric
            tv = th
        else:
            x_ref, th_ref, tv_ref, o_ref = refs
            th = th_ref[...]                      # (W, W) bf16, symmetric
            tv = tv_ref[...]                      # (H, H) bf16, symmetric

        bb, H, W = x_ref.shape

        # Horizontal "same" conv: one flattened (bb*H, W) @ (W, W) MXU matmul,
        # bf16 operands, f32 accumulation.
        x2 = x_ref[...].reshape(bb * H, W).astype(jnp.bfloat16)
        out1 = jnp.dot(x2, th, preferred_element_type=jnp.float32)   # (bb*H, W) f32

        # Vertical "same" conv as a second flattened matmul: transpose to
        # (bb, W, H) on the (otherwise idle) XLU, flatten to (bb*W, H), multiply
        # by the symmetric (H, H) Toeplitz, transpose back.
        out1_t = jnp.transpose(out1.reshape(bb, H, W), (0, 2, 1))
        out1_t = out1_t.reshape(bb * W, H).astype(jnp.bfloat16)
        out2_t = jnp.dot(out1_t, tv, preferred_element_type=jnp.float32)  # (bb*W, H) f32
        out2 = jnp.transpose(out2_t.reshape(bb, W, H), (0, 2, 1))

        o_ref[...] = out2.astype(o_ref.dtype)

    return kernel


# ------------------------------- wrappers / block sizing ----------------------------

_VMEM_BUDGET = 40 << 20   # keep under v7x's 64 MiB physical VMEM with headroom
_VMEM_FLOOR = 32 << 20    # v5e's scoped default is only 16 MiB
_VMEM_CEIL = 100 << 20


def _blur_fused_small(x3: jax.Array, g: np.ndarray, pad: int) -> jax.Array:
    """x3: (N, H, W) with W < 128 and H*W <= 1024."""
    N, H, W = x3.shape
    HW = H * W

    # out_flat = x_flat @ kron(T_H, T_W): both factors symmetric, so the combined
    # matrix is exactly the separable zero-padded blur on the row-major flattening.
    t_h = banded_toeplitz(g, pad, H)
    t_w = t_h if H == W else banded_toeplitz(g, pad, W)
    m = jnp.asarray(np.kron(t_h, t_w), dtype=jnp.bfloat16)        # (HW, HW)

    x2 = x3.reshape(N, HW)                                        # free view, no HBM pass

    itemsize = x3.dtype.itemsize
    bb = min(max(1, (2 << 20) // (HW * itemsize)), N)             # ~2 MiB input block
    if N >= 16:
        # Leave >= 2 grid steps so the batch axis can shard across v7x's 2 TCs.
        half = (((N + 1) // 2) + 7) // 8 * 8
        bb = min(bb, half)
    if bb < N:
        bb = max(8, (bb // 8) * 8)                                # sublane-aligned blocks
    grid_n = pl.cdiv(N, bb)                                       # ragged tail OK (rows indep.)

    est = (4 * bb * HW * itemsize            # in + out blocks, double-buffered
           + 2 * 2 * HW * HW                 # bf16 kron matrix, double-buffered
           + bb * HW * (2 + 4)               # bf16 cast + f32 matmul result
           + (2 << 20))
    vmem_limit = int(min(max(est, _VMEM_FLOOR), _VMEM_CEIL))

    out = pl.pallas_call(
        _fused_kron_kernel,
        out_shape=jax.ShapeDtypeStruct((N, HW), x3.dtype),
        grid_spec=pltpu.PrefetchScalarGridSpec(
            num_scalar_prefetch=0,
            grid=(grid_n,),
            in_specs=[pl.BlockSpec((bb, HW), lambda n: (n, 0)),
                      pl.BlockSpec((HW, HW), lambda n: (0, 0))],
            out_specs=pl.BlockSpec((bb, HW), lambda n: (n, 0)),
        ),
        compiler_params=pltpu.CompilerParams(
            dimension_semantics=("parallel",),
            vmem_limit_bytes=vmem_limit,
        ),
    )(x2, m)
    return out.reshape(N, H, W)


def _blur_two_pass(x3: jax.Array, g: np.ndarray, pad: int) -> jax.Array:
    """x3: (N, H, W).  General path: two flattened Toeplitz matmuls per block."""
    N, H, W = x3.shape
    square = (H == W)

    th = jnp.asarray(banded_toeplitz(g, pad, W), dtype=jnp.bfloat16)       # x @ Th
    if square:
        mats = (th,)                                                        # Tv == Th
    else:
        mats = (th, jnp.asarray(banded_toeplitz(g, pad, H), dtype=jnp.bfloat16))

    itemsize = x3.dtype.itemsize
    plane = H * W
    wt_bytes = 2 * 2 * (W * W + (0 if square else H * H))   # double-buffered bf16 weights
    per_img = 36 * plane                                     # dbuf in/out + all f32/bf16 temps
    bb_budget = max(1, (_VMEM_BUDGET - wt_bytes - (2 << 20)) // per_img)
    bb_io = max(1, (4 << 20) // (plane * itemsize))          # ~4 MiB input block target
    bb = min(bb_budget, bb_io, N)
    if N > 1:
        bb = min(bb, -(-N // 2))                             # >= 2 steps for megacore
    grid_n = pl.cdiv(N, bb)                                  # ragged tail OK (images indep.)

    est = per_img * bb + wt_bytes + (2 << 20)
    vmem_limit = int(min(max(est, _VMEM_FLOOR), _VMEM_CEIL))

    in_specs = [pl.BlockSpec((bb, H, W), lambda n: (n, 0, 0)),
                pl.BlockSpec((W, W), lambda n: (0, 0))]
    if not square:
        in_specs.append(pl.BlockSpec((H, H), lambda n: (0, 0)))

    return pl.pallas_call(
        _make_two_pass_kernel(square),
        out_shape=jax.ShapeDtypeStruct((N, H, W), x3.dtype),
        grid_spec=pltpu.PrefetchScalarGridSpec(
            num_scalar_prefetch=0,
            grid=(grid_n,),
            in_specs=in_specs,
            out_specs=pl.BlockSpec((bb, H, W), lambda n: (n, 0, 0)),
        ),
        compiler_params=pltpu.CompilerParams(
            dimension_semantics=("parallel",),
            vmem_limit_bytes=vmem_limit,
        ),
    )(x3, *mats)


def gaussian_blur(x: jax.Array, std: float = 2.0) -> jax.Array:
    N, C, H, W = x.shape
    assert C == 1, "GaussianBlur's [1,1,1,K] conv weight implies a single channel"

    image_size = min(H, W)
    k_size = appropriate_kernel_size(std)
    k_size = min(k_size, nearest_odd_integer(image_size, higher=False))
    assert k_size % 2 == 1, "kernel size should be odd"
    assert k_size >= 1, "image too small for a valid gaussian kernel"
    pad = k_size // 2
    g = gaussian_kernel_1d(std, k_size)

    x3 = x.reshape(N, H, W)   # free view of the contiguous NCHW array (C == 1)

    if W < 128 and H * W <= 1024:
        out = _blur_fused_small(x3, g, pad)
    else:
        # TODO(synk): for W < 128 with large H*W, pack ceil(128/W) images along the
        #             lane axis (block-diagonal Toeplitz) so output stores stay lane-dense.
        # TODO(synk): for planes >= ~512, contract only the +-pad Toeplitz band via a
        #             column-tile grid axis (and tile H/W) instead of the dense matmuls,
        #             so a single plane never exceeds the ~40 MiB VMEM budget.
        out = _blur_two_pass(x3, g, pad)

    return out.reshape(N, C, H, W)


# ------------------- pure-JAX reference (sanity check only) -------------------

def _reference_blur(x, std=2.0):
    N, C, H, W = x.shape
    k_size = min(appropriate_kernel_size(std),
                 nearest_odd_integer(min(H, W), higher=False))
    pad = k_size // 2
    g = jnp.asarray(gaussian_kernel_1d(std, k_size))
    xp = jnp.pad(x, ((0, 0), (0, 0), (0, 0), (pad, pad)))
    out1 = sum(g[k] * xp[..., :, k:k + W] for k in range(k_size))
    xp2 = jnp.pad(out1, ((0, 0), (0, 0), (pad, pad), (0, 0)))
    out2 = sum(g[k] * xp2[..., k:k + H, :] for k in range(k_size))
    return out2


if __name__ == "__main__":
    # Small image -> fused lane-dense single-matmul (kron) path.
    x_small = jax.random.normal(jax.random.PRNGKey(0), (2, 1, 16, 16), dtype=jnp.float32)
    out_small = jax.block_until_ready(gaussian_blur(x_small, std=2.0))
    ref_small = jax.block_until_ready(_reference_blur(x_small, std=2.0))
    assert out_small.shape == x_small.shape and out_small.dtype == x_small.dtype
    # bf16 operands / weights with f32 accumulation: ~1e-2 worst-case absolute
    # error vs the pure-f32 reference (structural bugs would be >= 0.1).
    np.testing.assert_allclose(np.asarray(out_small), np.asarray(ref_small),
                               rtol=4e-2, atol=4e-2)

    # Larger non-square image -> two-pass Toeplitz path (flattened vertical matmul).
    x_big = jax.random.normal(jax.random.PRNGKey(1), (2, 1, 128, 144), dtype=jnp.float32)
    out_big = jax.block_until_ready(gaussian_blur(x_big, std=2.0))
    ref_big = jax.block_until_ready(_reference_blur(x_big, std=2.0))
    assert out_big.shape == x_big.shape and out_big.dtype == x_big.dtype
    np.testing.assert_allclose(np.asarray(out_big), np.asarray(ref_big),
                               rtol=4e-2, atol=4e-2)

    print("KERNEL_OK")
</pallas_src>

<mosaic_0001>
module attributes {stable_mosaic.version = 11 : i64} {
  func.func @_fused_kron_kernel(%arg0: i32, %arg1: memref<2x256xf32, #tpu.memory_space<vmem>>, %arg2: memref<256x256xbf16, #tpu.memory_space<vmem>>, %arg3: memref<2x256xf32, #tpu.memory_space<vmem>>) attributes {dimension_semantics = [#tpu.dimension_semantics<parallel>], iteration_bounds = array<i64: 1>, scalar_prefetch = 0 : i64, scratch_operands = 0 : i64, tpu.core_type = #tpu.core_type<tc>, window_params = [{transform_indices = @transform_0, window_bounds = array<i64: 2, 256>}, {pipeline_mode = #tpu.pipeline_mode<synchronous>, transform_indices = @transform_1, window_bounds = array<i64: 256, 256>}, {transform_indices = @transform_2, window_bounds = array<i64: 2, 256>}]} {
    %c0 = arith.constant 0 : index
    %c0_0 = arith.constant 0 : index
    %0 = vector.load %arg1[%c0, %c0_0] : memref<2x256xf32, #tpu.memory_space<vmem>>, vector<2x256xf32>
    %1 = arith.truncf %0 : vector<2x256xf32> to vector<2x256xbf16>
    %c0_1 = arith.constant 0 : index
    %c0_2 = arith.constant 0 : index
    %2 = vector.load %arg2[%c0_1, %c0_2] : memref<256x256xbf16, #tpu.memory_space<vmem>>, vector<256x256xbf16>
    %cst = arith.constant dense<0.000000e+00> : vector<2x256xf32>
    %3 = tpu.matmul %1, %2, %cst {dimension_numbers = #tpu.dot_dimension_numbers<[1], [0], [0], [1], [0, 0, 1, 1], [], []>} : vector<2x256xbf16>, vector<256x256xbf16>, vector<2x256xf32> -> vector<2x256xf32>
    %c0_3 = arith.constant 0 : index
    %c0_4 = arith.constant 0 : index
    %4 = vector.load %arg3[%c0_3, %c0_4] : memref<2x256xf32, #tpu.memory_space<vmem>>, vector<2x256xf32>
    tpu.vector_store %arg3[%c0_3, %c0_4], %3 {strides = array<i32>} : memref<2x256xf32, #tpu.memory_space<vmem>>, vector<2x256xf32>,
    return
  }
  func.func @transform_0(%arg0: i32) -> (i32, i32) {
    %c0_i32 = arith.constant 0 : i32
    %c0_i32_0 = arith.constant 0 : i32
    return %arg0, %c0_i32 : i32, i32
  }
  func.func @transform_1(%arg0: i32) -> (i32, i32) {
    %c0_i32 = arith.constant 0 : i32
    %c0_i32_0 = arith.constant 0 : i32
    %c0_i32_1 = arith.constant 0 : i32
    return %c0_i32, %c0_i32_0 : i32, i32
  }
  func.func @transform_2(%arg0: i32) -> (i32, i32) {
    %c0_i32 = arith.constant 0 : i32
    %c0_i32_0 = arith.constant 0 : i32
    return %arg0, %c0_i32 : i32, i32
  }
}

</mosaic_0001>

<bundles_post_ra>
// kernel: tpu_custom_call.1
= control target key start
LH: loop header
LB: loop body
LE: loop exit
PB: predicated region body
PF: predicated region fallthrough
CT: control target
= control target key end

     0   :  { %7 = vsyncpa [#allocation3], 0  ;;  %s592_s0 = inlined_call_operand.hbm [shape: f32[2,256], index: 0, kind: input, shape index: {}]   ;;  %s593_s1 = inlined_call_operand.hbm [shape: bf16[256,256], index: 1, kind: input, shape index: {}]   ;;  %s594_s2 = inlined_call_operand.hbm [shape: f32[2,256], index: 2, kind: output, shape index: {}]  }
   0x1   :  { %8 = vsyncpa [#allocation6], 0 }
   0x2   :  { %9 = vsyncpa [#allocation4], 0  ;;  %s15_s11 = sshll.u32 %s592_s0, 4  ;;  %s563_s12 = smov [#allocation2]   ;;  %s16_s11 = int_to_ptr.hbm [resolvable:$true] %s15_s11 }
   0x3   :  { %s17_s13 = sshll.u32 %s563_s12, 4  ;;  %s25_s16 = sshll.u32 %s593_s1, 4  ;;  %s18_s13 = int_to_ptr.vmem [resolvable:$true] %s17_s13  ;;  %s26_s16 = int_to_ptr.hbm [resolvable:$true] %s25_s16 }
   0x4   :  { %20 = dma.hbm_to_vmem [thread:$0]  %s16_s11, 64, %s18_s13, [#allocation3]  }
   0x5   :  { %s564_s17 = smov [#allocation5]   ;;  %s565_s19 = smov 128  }
   0x6   :  { %s27_s18 = sshll.u32 %s564_s17, 4  ;;  %s566_s20 = smov 8   ;;  %s28_s18 = int_to_ptr.vmem [resolvable:$true] %s27_s18 }
   0x7   :  { %33 = dma.hbm_to_vmem [thread:$0]  %s26_s16, 4096, %s28_s18, [#allocation6], %s565_s19, %s565_s19, %s566_s20  }
   0x8   :  { %557 = dma.done.wait [#allocation3], 64  }
   0x9   :  { %558 = vsyncadd [#allocation3], 4294967232 }
   0xa   :  { %559 = dma.done.wait [#allocation6], 4096  }
   0xb   :  { %560 = vsyncadd [#allocation6], 4294963200  ;;  %v378_v0 = vld [vmem:[#allocation5 + $0x70] sm:$0xf]  ;;  %v463_v1 = vld [vmem:[#allocation5 + $0x74] sm:$0xf0] }
   0xc   :  { %v442_v2 = vld [vmem:[#allocation5 + $0xf0] sm:$0xf]  ;;  %v379_v3 = vor.u32 %v463_v1, %v378_v0  ;;  %v479_v4 = vld [vmem:[#allocation5 + $0xf4] sm:$0xf0]  ;;  %v462_v5 = vld [vmem:[#allocation5 + $0x74] sm:$0xf] }
   0xd   :  { %v380_v6 = vld [vmem:[#allocation5 + $0x78] sm:$0xf0]  ;;  %v443_v7 = vor.u32 %v479_v4, %v442_v2  ;;  %v478_v9 = vld [vmem:[#allocation5 + $0xf4] sm:$0xf]  ;;  %v370_v11 = vld [vmem:[#allocation5 + $0x60] sm:$0xf] }
   0xe   :  { %v383_v8 = vor.u32 %v462_v5, %v380_v6  ;;  %v444_v10 = vld [vmem:[#allocation5 + $0xf8] sm:$0xf0]  ;;  %243 = vmatpush.bf16.msra.mxu0 %v379_v3  ;;  %v461_v13 = vld [vmem:[#allocation5 + $0x64] sm:$0xf0]  ;;  %v434_v14 = vld [vmem:[#allocation5 + $0xe0] sm:$0xf] }
   0xf   :  { %v447_v12 = vor.u32 %v478_v9, %v444_v10  ;;  %v477_v15 = vld [vmem:[#allocation5 + $0xe4] sm:$0xf0]  ;;  %256 = vmatpush.bf16.msra.mxu1 %v443_v7  ;;  %v371_v16 = vor.u32 %v461_v13, %v370_v11  ;;  %v460_v18 = vld [vmem:[#allocation5 + $0x64] sm:$0xf]  ;;  %v372_v19 = vld [vmem:[#allocation5 + $0x68] sm:$0xf0] }
  0x10   :  { %269 = vmatpush.bf16.msra.mxu2 %v383_v8  ;;  %v435_v17 = vor.u32 %v477_v15, %v434_v14  ;;  %v476_v20 = vld [vmem:[#allocation5 + $0xe4] sm:$0xf]  ;;  %v375_v21 = vor.u32 %v460_v18, %v372_v19  ;;  %v436_v22 = vld [vmem:[#allocation5 + $0xe8] sm:$0xf0]  ;;  %v362_v23 = vld [vmem:[#allocation5 + $0x50] sm:$0xf] }
  0x11   :  { %282 = vmatpush.bf16.msra.mxu3 %v447_v12  ;;  %v459_v24 = vld [vmem:[#allocation5 + $0x54] sm:$0xf0]  ;;  %v439_v25 = vor.u32 %v476_v20, %v436_v22  ;;  %v426_v26 = vld [vmem:[#allocation5 + $0xd0] sm:$0xf]  ;;  %v458_v28 = vld [vmem:[#allocation5 + $0x54] sm:$0xf] }
  0x12   :  { %v475_v27 = vld [vmem:[#allocation5 + $0xd4] sm:$0xf0]  ;;  %244 = vmatpush.bf16.msra.mxu0 %v371_v16  ;;  %v363_v29 = vor.u32 %v459_v24, %v362_v23  ;;  %v364_v30 = vld [vmem:[#allocation5 + $0x58] sm:$0xf0]  ;;  %v474_v31 = vld [vmem:[#allocation5 + $0xd4] sm:$0xf] }
  0x13   :  { %v428_v32 = vld [vmem:[#allocation5 + $0xd8] sm:$0xf0]  ;;  %257 = vmatpush.bf16.msra.mxu1 %v435_v17  ;;  %v427_v33 = vor.u32 %v475_v27, %v426_v26  ;;  %v367_v34 = vor.u32 %v458_v28, %v364_v30  ;;  %v354_v35 = vld [vmem:[#allocation5 + $0x40] sm:$0xf]  ;;  %v457_v36 = vld [vmem:[#allocation5 + $0x44] sm:$0xf0] }
  0x14   :  { %270 = vmatpush.bf16.msra.mxu2 %v375_v21  ;;  %v418_v37 = vld [vmem:[#allocation5 + $0xc0] sm:$0xf]  ;;  %v431_v38 = vor.u32 %v474_v31, %v428_v32  ;;  %v473_v39 = vld [vmem:[#allocation5 + $0xc4] sm:$0xf0]  ;;  %v456_v40 = vld [vmem:[#allocation5 + $0x44] sm:$0xf]  ;;  %v355_v44 = vor.u32 %v457_v36, %v354_v35 }
  0x15   :  { %283 = vmatpush.bf16.msra.mxu3 %v439_v25  ;;  %v356_v41 = vld [vmem:[#allocation5 + $0x48] sm:$0xf0]  ;;  %v472_v42 = vld [vmem:[#allocation5 + $0xc4] sm:$0xf]  ;;  %v419_v45 = vor.u32 %v473_v39, %v418_v37  ;;  %v346_v47 = vld [vmem:[#allocation5 + $0x30] sm:$0xf] }
  0x16   :  { %v420_v43 = vld [vmem:[#allocation5 + $0xc8] sm:$0xf0]  ;;  %245 = vmatpush.bf16.msra.mxu0 %v363_v29  ;;  %v359_v46 = vor.u32 %v456_v40, %v356_v41  ;;  %v455_v48 = vld [vmem:[#allocation5 + $0x34] sm:$0xf0]  ;;  %v410_v49 = vld [vmem:[#allocation5 + $0xb0] sm:$0xf] }
  0x17   :  { %258 = vmatpush.bf16.msra.mxu1 %v427_v33  ;;  %v423_v50 = vor.u32 %v472_v42, %v420_v43  ;;  %v471_v51 = vld [vmem:[#allocation5 + $0xb4] sm:$0xf0]  ;;  %v454_v52 = vld [vmem:[#allocation5 + $0x34] sm:$0xf]  ;;  %v348_v53 = vld [vmem:[#allocation5 + $0x38] sm:$0xf0]  ;;  %v347_v56 = vor.u32 %v455_v48, %v346_v47 }
  0x18   :  { %271 = vmatpush.bf16.msra.mxu2 %v367_v34  ;;  %v470_v54 = vld [vmem:[#allocation5 + $0xb4] sm:$0xf]  ;;  %v412_v55 = vld [vmem:[#allocation5 + $0xb8] sm:$0xf0]  ;;  %v411_v57 = vor.u32 %v471_v51, %v410_v49  ;;  %v351_v58 = vor.u32 %v454_v52, %v348_v53  ;;  %v338_v59 = vld [vmem:[#allocation5 + $0x20] sm:$0xf] }
  0x19   :  { %284 = vmatpush.bf16.msra.mxu3 %v431_v38  ;;  %v453_v60 = vld [vmem:[#allocation5 + $0x24] sm:$0xf0]  ;;  %v402_v61 = vld [vmem:[#allocation5 + $0xa0] sm:$0xf]  ;;  %v415_v62 = vor.u32 %v470_v54, %v412_v55  ;;  %v452_v0 = vld [vmem:[#allocation5 + $0x24] sm:$0xf] }
  0x1a   :  { %246 = vmatpush.bf16.msra.mxu0 %v355_v44  ;;  %v469_v63 = vld [vmem:[#allocation5 + $0xa4] sm:$0xf0]  ;;  %v340_v1 = vld [vmem:[#allocation5 + $0x28] sm:$0xf0]  ;;  %v468_v2 = vld [vmem:[#allocation5 + $0xa4] sm:$0xf]  ;;  %v339_v4 = vor.u32 %v453_v60, %v338_v59 }
  0x1b   :  { %259 = vmatpush.bf16.msra.mxu1 %v419_v45  ;;  %v404_v3 = vld [vmem:[#allocation5 + $0xa8] sm:$0xf0]  ;;  %v330_v5 = vld [vmem:[#allocation5 + $0x10] sm:$0xf]  ;;  %v403_v6 = vor.u32 %v469_v63, %v402_v61  ;;  %v343_v7 = vor.u32 %v452_v0, %v340_v1  ;;  %v451_v8 = vld [vmem:[#allocation5 + $0x14] sm:$0xf0] }
  0x1c   :  { %272 = vmatpush.bf16.msra.mxu2 %v359_v46  ;;  %v394_v9 = vld [vmem:[#allocation5 + $0x90] sm:$0xf]  ;;  %v467_v10 = vld [vmem:[#allocation5 + $0x94] sm:$0xf0]  ;;  %v407_v11 = vor.u32 %v468_v2, %v404_v3  ;;  %v450_v12 = vld [vmem:[#allocation5 + $0x14] sm:$0xf]  ;;  %v331_v17 = vor.u32 %v451_v8, %v330_v5 }
  0x1d   :  { %285 = vmatpush.bf16.msra.mxu3 %v423_v50  ;;  %v332_v13 = vld [vmem:[#allocation5 + $0x18] sm:$0xf0]  ;;  %v466_v15 = vld [vmem:[#allocation5 + $0x94] sm:$0xf]  ;;  %v395_v18 = vor.u32 %v467_v10, %v394_v9  ;;  %v322_v20 = vld [vmem:[#allocation5] sm:$0xf] }
  0x1e   :  { %247 = vmatpush.bf16.msra.mxu0 %v347_v56  ;;  %v42_v14 = vld [vmem:[#allocation2] sm:$0xf]  ;;  %v335_v19 = vor.u32 %v450_v12, %v332_v13  ;;  %v449_v21 = vld [vmem:[#allocation5 + $0x4] sm:$0xf0]  ;;  %v386_v22 = vld [vmem:[#allocation5 + $0x80] sm:$0xf] }
  0x1f   :  { %260 = vmatpush.bf16.msra.mxu1 %v411_v57  ;;  %v396_v16 = vld [vmem:[#allocation5 + $0x98] sm:$0xf0]  ;;  %44 = vst [vmem:[#allocation1] ss:$4 sm:$0xff] %v42_v14  ;;  %v465_v24 = vld [vmem:[#allocation5 + $0x84] sm:$0xf0]  ;;  %v323_v29 = vor.u32 %v449_v21, %v322_v20 }
  0x20   :  { %273 = vmatpush.bf16.msra.mxu2 %v351_v58  ;;  %v399_v23 = vor.u32 %v466_v15, %v396_v16  ;;  %v448_v25 = vld [vmem:[#allocation5 + $0x4] sm:$0xf]  ;;  %v324_v26 = vld [vmem:[#allocation5 + $0x8] sm:$0xf0]  ;;  %v387_v30 = vor.u32 %v465_v24, %v386_v22  ;;  %s567_s0 = smov [#allocation7]   ;;  %s309_s23 = sshll.u32 %s594_s2, 4  ;;  %s310_s23 = int_to_ptr.hbm [resolvable:$true] %s309_s23 }
  0x21   :  { %286 = vmatpush.bf16.msra.mxu3 %v415_v62  ;;  %v464_v27 = vld [vmem:[#allocation5 + $0x84] sm:$0xf]  ;;  %v388_v28 = vld [vmem:[#allocation5 + $0x88] sm:$0xf0]  ;;  %v327_v31 = vor.u32 %v448_v25, %v324_v26  ;;  %s307_s1 = sshll.u32 %s567_s0, 4  ;;  %vm298_vm0 = vcmask 1041408   ;;  %s308_s1 = int_to_ptr.vmem [resolvable:$true] %s307_s1 }
  0x22   :  { %248 = vmatpush.bf16.msra.mxu0 %v339_v4  ;;  %v391_v32 = vor.u32 %v464_v27, %v388_v28 }
  0x23   :  { %261 = vmatpush.bf16.msra.mxu1 %v403_v6 }
  0x24   :  { %274 = vmatpush.bf16.msra.mxu2 %v343_v7 }
  0x25   :  { %287 = vmatpush.bf16.msra.mxu3 %v407_v11 }
  0x26   :  { %249 = vmatpush.bf16.msra.mxu0 %v331_v17  ;;  %v45_v33 = vld.sshfl [vmem:[#allocation1] sm:$0xff pattern:$0x73625140]  ;;  %v46_v34 = vld.sshfl [vmem:[#allocation1 + $0x8] sm:$0xff pattern:$0x73625140] }
  0x27   :  { %262 = vmatpush.bf16.msra.mxu1 %v395_v18  ;;  %v49_v35 = vpack.c.bf16 %v45_v33, %v45_v33  ;;  %v50_v36 = vpack.c.bf16 %v46_v34, %v46_v34 }
  0x28   :  { %275 = vmatpush.bf16.msra.mxu2 %v335_v19 }
  0x29   :  { %288 = vmatpush.bf16.msra.mxu3 %v399_v23 }
  0x2a   :  { %250 = vmatpush.bf16.msra.mxu0 %v323_v29 }
  0x2b   :  { %263 = vmatpush.bf16.msra.mxu1 %v387_v30 }
  0x2c   :  { %276 = vmatpush.bf16.msra.mxu2 %v327_v31 }
  0x2d   :  { %289 = vmatpush.bf16.msra.mxu3 %v391_v32  ;;  %251 = vmatmul.bf16.vlgmr.msra.gmra.mxu0 %v49_v35 }
  0x2e   :  { %264 = vmatmul.bf16.vlgmr.msra.gmra.mxu1 %v50_v36 }
  0x2f   :  { %277 = vmatmul.bf16.vlgmr.msra.gmra.mxu2 %v49_v35 }
  0x30   :  { %290 = vmatmul.bf16.vlgmr.msra.gmra.mxu3 %v50_v36 }
  0xaa   :  { %v252_v37 = vpop.f32.mrf.mxu0 }
  0xab   :  { %v265_v38 = vpop.f32.mrf.mxu1 }
  0xac   :  { %v266_v44 = vadd.f32 %v265_v38, %v252_v37 }
  0xb2   :  { %v278_v39 = vpop.f32.mrf.mxu2  ;;  %v254_v41 = vpop.f32.mrf.mxu0 }
  0xb3   :  { %v291_v40 = vpop.f32.mrf.mxu3  ;;  %v267_v43 = vpop.f32.mrf.mxu1 }
  0xb4   :  { %v292_v42 = vadd.f32 %v291_v40, %v278_v39 }
  0xb6   :  { %v297_v45 = vrot.slane %v292_v42, 6 }
  0xb8   :  { %v299_v46 = vsel %vm298_vm0, %v266_v44, %v297_v45 }
  0xb9   :  { %301 = vst [vmem:[#allocation7] sm:$0xf] %v299_v46 }
  0xba   :  { %v280_v47 = vpop.f32.mrf.mxu2  ;;  %312 = dma.vmem_to_hbm [thread:$0]  %s308_s1, 64, %s310_s23, [#allocation4]  }
  0xbb   :  { %v293_v48 = vpop.f32.mrf.mxu3 }
  0xbc   :  { %561 = dma.done.wait [#allocation4], 64  }
  0xbd   :  { %562 = vsyncadd [#allocation4], 4294967232 }
  0xbe   :  { %317 = vsyncpa [#allocation3], 1 }
  0xbf   :  { %318 = vsyncpa [#allocation6], 1 }
  0xc0   :  { %319 = vsyncpa [#allocation4], 1 }

</bundles_post_ra>
